<compile_context>
chip_gen: v5e
topology: v5e:2x2
jax: 0.10.0
libtpu: 0.0.40
codegen_flags: <defaults>
</compile_context>

<pallas_src>
import jax
import jax.numpy as jnp
from jax.experimental import pallas as pl
from jax.experimental.pallas import tpu as pltpu


def _round_up(n, m):
    return ((n + m - 1) // m) * m


def _default_fold():
    # v5e MXU is 128 wide -> r=4 (r*H = 128 for H=32); v6e/v7x are 256 wide -> r=8.
    try:
        kind = jax.devices()[0].device_kind.lower()
    except Exception:
        return 8
    return 4 if "v5" in kind else 8


def _block_diag(w, r):
    """(in, out) -> (r*in, r*out) with r copies of w on the block diagonal."""
    if r == 1:
        return w
    in_f, out_f = w.shape
    eye = jnp.eye(r, dtype=w.dtype)
    bd = eye[:, None, :, None] * w[None, :, None, :]     # (r, in, r, out)
    return bd.reshape(r * in_f, r * out_f)


def _task_scorer_kernel(tf_ref, ps_ref, w1t_ref, w1p_ref, b1_ref,
                        w2_ref, b2_ref, w3_ref, b3_ref, out_ref):
    # Cast the batch stream to bf16 in-kernel (stream stays f32 in HBM; the
    # cast rides the VPU). Accumulation, bias adds and ReLU stay in f32.
    tf = tf_ref[...].astype(jnp.bfloat16)                  # (TBg, r*Ft)
    ps = ps_ref[...].astype(jnp.bfloat16)                  # (TBg, r*Fp)

    # fc1: fused concat (split W1) + r-row lane packing (block-diag weights).
    h1 = jnp.dot(tf, w1t_ref[...], preferred_element_type=jnp.float32)
    h1 = h1 + jnp.dot(ps, w1p_ref[...], preferred_element_type=jnp.float32)
    h1 = jnp.maximum(h1 + b1_ref[...], 0.0)                # (TBg, r*H) f32

    # fc2 + relu (bf16 MXU inputs, f32 accumulate / elementwise).
    h2 = jnp.dot(h1.astype(jnp.bfloat16), w2_ref[...],
                 preferred_element_type=jnp.float32)
    h2 = jnp.maximum(h2 + b2_ref[...], 0.0)                # (TBg, r*H) f32

    # fc3 on the MXU: block-diagonal (r*H, r) weight -> per-sub-row scores.
    score = jnp.dot(h2.astype(jnp.bfloat16), w3_ref[...],
                    preferred_element_type=jnp.float32)    # (TBg, r)
    score = score + b3_ref[0]                              # SMEM scalar bias

    out_ref[...] = score.astype(out_ref.dtype)


def task_scorer_forward(task_features, player_state, params, *,
                        block_rows=8192, fold=None):
    """Pallas implementation of TaskScorerNN.forward.

    task_features: (B, Ft) or (Ft,)   player_state: (B, Fp) or (Fp,)
    Returns scores of shape (B, 1), or (1,) if both inputs were 1-D.
    """
    w1t, w1p, b1, w2, b2, w3, b3 = params

    squeeze_batch = False
    if task_features.ndim == 1 and player_state.ndim == 1:
        task_features = task_features[None, :]
        player_state = player_state[None, :]
        squeeze_batch = True

    tf = task_features.astype(jnp.float32)
    ps = player_state.astype(jnp.float32)

    B, Ft = tf.shape
    Fp = ps.shape[1]
    H = w2.shape[0]

    # Fold factor: pack r batch rows per folded row, capped so r*H stays at or
    # below one MXU pass width (<=256) and weight VMEM stays tiny.
    if fold is None:
        fold = _default_fold()
    r = max(1, min(fold, max(1, 256 // H)))

    # ---- batch tiling over folded rows -------------------------------------
    G = _round_up(B, r) // r                   # folded rows actually needed
    G8 = _round_up(G, 8)                       # sublane granularity
    block_g = max(8, _round_up(block_rows // r, 8))
    # >=2 tiles when there is enough work so both v7x TensorCores get a share
    # (one extra grid step ~0.35us is noise on v5e/v6e); tile size is then
    # rebalanced so padding never wastes a whole tile of compute.
    want_tiles = max(pl.cdiv(G8, block_g), 2 if G8 >= 16 else 1)
    TBg = _round_up(pl.cdiv(G8, want_tiles), 8)
    G_pad = _round_up(G8, TBg)
    n_tiles = G_pad // TBg

    rows_pad = G_pad * r
    if rows_pad != B:
        tf = jnp.pad(tf, ((0, rows_pad - B), (0, 0)))
        ps = jnp.pad(ps, ((0, rows_pad - B), (0, 0)))
    tf_f = tf.reshape(G_pad, r * Ft)           # free row-major fold
    ps_f = ps.reshape(G_pad, r * Fp)

    # ---- weights: block-diagonal bf16 for the MXU; biases tiled, f32 -------
    # Tiny and VMEM-resident across all grid steps (constant index_maps);
    # constant-folded/hoisted under jit.
    w1t_bd = _block_diag(w1t, r).astype(jnp.bfloat16)            # (r*Ft, r*H)
    w1p_bd = _block_diag(w1p, r).astype(jnp.bfloat16)            # (r*Fp, r*H)
    w2_bd = _block_diag(w2, r).astype(jnp.bfloat16)              # (r*H, r*H)
    w3_bd = _block_diag(w3.reshape(H, 1), r).astype(jnp.bfloat16)  # (r*H, r)
    b1_t = jnp.tile(b1.astype(jnp.float32), (1, r))              # (1, r*H)
    b2_t = jnp.tile(b2.astype(jnp.float32), (1, r))              # (1, r*H)
    b3_s = b3.reshape(1).astype(jnp.float32)                     # SMEM scalar

    out = pl.pallas_call(
        _task_scorer_kernel,
        out_shape=jax.ShapeDtypeStruct((G_pad, r), jnp.float32),
        grid=(n_tiles,),
        in_specs=[
            pl.BlockSpec((TBg, r * Ft), lambda i: (i, 0)),       # folded task tile
            pl.BlockSpec((TBg, r * Fp), lambda i: (i, 0)),       # folded player tile
            pl.BlockSpec((r * Ft, r * H), lambda i: (0, 0)),     # W1_task   (resident)
            pl.BlockSpec((r * Fp, r * H), lambda i: (0, 0)),     # W1_player (resident)
            pl.BlockSpec((1, r * H), lambda i: (0, 0)),          # b1 (tiled)
            pl.BlockSpec((r * H, r * H), lambda i: (0, 0)),      # W2        (resident)
            pl.BlockSpec((1, r * H), lambda i: (0, 0)),          # b2 (tiled)
            pl.BlockSpec((r * H, r), lambda i: (0, 0)),          # W3        (resident)
            pl.BlockSpec(memory_space=pltpu.MemorySpace.SMEM),   # b3 scalar
        ],
        out_specs=pl.BlockSpec((TBg, r), lambda i: (i, 0)),
        compiler_params=pltpu.CompilerParams(
            dimension_semantics=("parallel",)),
    )(tf_f, ps_f, w1t_bd, w1p_bd, b1_t, w2_bd, b2_t, w3_bd, b3_s)

    # Free row-major unfold (G_pad, r) -> (G_pad*r, 1), then trim padding.
    score = out.reshape(G_pad * r, 1)[:B]
    if squeeze_batch:
        score = score[0]
    return score


def init_params(task_feature_size, player_state_size, hidden_size, key):
    """Deterministic init matching nn.Linear shapes (uniform +/-1/sqrt(fan_in)).

    fc1's weight is stored pre-split into (task, player) halves so the concat
    can be fused into the kernel.
    """
    fin = task_feature_size + player_state_size
    k = jax.random.split(key, 7)

    def lin_w(kw, in_f, out_f, fan_in):
        bound = 1.0 / jnp.sqrt(jnp.float32(fan_in))
        return jax.random.uniform(kw, (in_f, out_f), jnp.float32, -bound, bound)

    def lin_b(kb, out_f, fan_in):
        bound = 1.0 / jnp.sqrt(jnp.float32(fan_in))
        return jax.random.uniform(kb, (1, out_f), jnp.float32, -bound, bound)

    w1t = lin_w(k[0], task_feature_size, hidden_size, fin)
    w1p = lin_w(k[1], player_state_size, hidden_size, fin)
    b1 = lin_b(k[2], hidden_size, fin)
    w2 = lin_w(k[3], hidden_size, hidden_size, hidden_size)
    b2 = lin_b(k[4], hidden_size, hidden_size)
    w3 = lin_w(k[5], hidden_size, 1, hidden_size).reshape(1, hidden_size)  # row form
    b3 = lin_b(k[6], 1, hidden_size).reshape(1)
    return (w1t, w1p, b1, w2, b2, w3, b3)


if __name__ == "__main__":
    task_feature_size = 8
    player_state_size = 8
    hidden_size = 32
    batch = 2

    key = jax.random.PRNGKey(0)
    k_params, k_task, k_player = jax.random.split(key, 3)

    params = init_params(task_feature_size, player_state_size, hidden_size,
                         k_params)
    task_features = jax.random.normal(k_task, (batch, task_feature_size),
                                      jnp.float32)
    player_state = jax.random.normal(k_player, (batch, player_state_size),
                                     jnp.float32)

    score = task_scorer_forward(task_features, player_state, params)
    jax.block_until_ready(score)

    # Reference in plain JAX with the same bf16 matmul inputs / f32 epilogue.
    w1t, w1p, b1, w2, b2, w3, b3 = params
    bf = lambda a: a.astype(jnp.bfloat16).astype(jnp.float32)
    h1 = jnp.maximum(bf(task_features) @ bf(w1t)
                     + bf(player_state) @ bf(w1p) + b1, 0.0)
    h2 = jnp.maximum(bf(h1) @ bf(w2) + b2, 0.0)
    ref = bf(h2) @ bf(w3).T + b3

    assert score.shape == (batch, 1), score.shape
    assert jnp.allclose(score, ref, atol=2e-3, rtol=2e-3), (score, ref)

    print("KERNEL_OK")
</pallas_src>

<mosaic_0001>
module attributes {stable_mosaic.version = 11 : i64} {
  func.func @_task_scorer_kernel(%arg0: i32, %arg1: memref<8x64xf32, #tpu.memory_space<vmem>>, %arg2: memref<8x64xf32, #tpu.memory_space<vmem>>, %arg3: memref<64x256xbf16, #tpu.memory_space<vmem>>, %arg4: memref<64x256xbf16, #tpu.memory_space<vmem>>, %arg5: memref<1x256xf32, #tpu.memory_space<vmem>>, %arg6: memref<256x256xbf16, #tpu.memory_space<vmem>>, %arg7: memref<1x256xf32, #tpu.memory_space<vmem>>, %arg8: memref<256x8xbf16, #tpu.memory_space<vmem>>, %arg9: memref<1xf32, #tpu.memory_space<smem>>, %arg10: memref<8x8xf32, #tpu.memory_space<vmem>>) attributes {dimension_semantics = [#tpu.dimension_semantics<parallel>], iteration_bounds = array<i64: 1>, scalar_prefetch = 0 : i64, scratch_operands = 0 : i64, tpu.core_type = #tpu.core_type<tc>, window_params = [{transform_indices = @transform_0, window_bounds = array<i64: 8, 64>}, {transform_indices = @transform_1, window_bounds = array<i64: 8, 64>}, {pipeline_mode = #tpu.pipeline_mode<synchronous>, transform_indices = @transform_2, window_bounds = array<i64: 64, 256>}, {pipeline_mode = #tpu.pipeline_mode<synchronous>, transform_indices = @transform_3, window_bounds = array<i64: 64, 256>}, {pipeline_mode = #tpu.pipeline_mode<synchronous>, transform_indices = @transform_4, window_bounds = array<i64: 1, 256>}, {pipeline_mode = #tpu.pipeline_mode<synchronous>, transform_indices = @transform_5, window_bounds = array<i64: 256, 256>}, {pipeline_mode = #tpu.pipeline_mode<synchronous>, transform_indices = @transform_6, window_bounds = array<i64: 1, 256>}, {pipeline_mode = #tpu.pipeline_mode<synchronous>, transform_indices = @transform_7, window_bounds = array<i64: 256, 8>}, {transform_indices = @transform_8, window_bounds = array<i64: 1>}, {transform_indices = @transform_9, window_bounds = array<i64: 8, 8>}]} {
    %c0 = arith.constant 0 : index
    %c0_0 = arith.constant 0 : index
    %0 = vector.load %arg1[%c0, %c0_0] : memref<8x64xf32, #tpu.memory_space<vmem>>, vector<8x64xf32>
    %1 = arith.truncf %0 : vector<8x64xf32> to vector<8x64xbf16>
    %c0_1 = arith.constant 0 : index
    %c0_2 = arith.constant 0 : index
    %2 = vector.load %arg2[%c0_1, %c0_2] : memref<8x64xf32, #tpu.memory_space<vmem>>, vector<8x64xf32>
    %3 = arith.truncf %2 : vector<8x64xf32> to vector<8x64xbf16>
    %c0_3 = arith.constant 0 : index
    %c0_4 = arith.constant 0 : index
    %4 = vector.load %arg3[%c0_3, %c0_4] : memref<64x256xbf16, #tpu.memory_space<vmem>>, vector<64x256xbf16>
    %cst = arith.constant dense<0.000000e+00> : vector<8x256xf32>
    %5 = tpu.matmul %1, %4, %cst {dimension_numbers = #tpu.dot_dimension_numbers<[1], [0], [0], [1], [0, 0, 1, 1], [], []>} : vector<8x64xbf16>, vector<64x256xbf16>, vector<8x256xf32> -> vector<8x256xf32>
    %c0_5 = arith.constant 0 : index
    %c0_6 = arith.constant 0 : index
    %6 = vector.load %arg4[%c0_5, %c0_6] : memref<64x256xbf16, #tpu.memory_space<vmem>>, vector<64x256xbf16>
    %cst_7 = arith.constant dense<0.000000e+00> : vector<8x256xf32>
    %7 = tpu.matmul %3, %6, %cst_7 {dimension_numbers = #tpu.dot_dimension_numbers<[1], [0], [0], [1], [0, 0, 1, 1], [], []>} : vector<8x64xbf16>, vector<64x256xbf16>, vector<8x256xf32> -> vector<8x256xf32>
    %8 = arith.addf %5, %7 : vector<8x256xf32>
    %c0_8 = arith.constant 0 : index
    %c0_9 = arith.constant 0 : index
    %9 = vector.load %arg5[%c0_8, %c0_9] : memref<1x256xf32, #tpu.memory_space<vmem>>, vector<1x256xf32>
    %10 = vector.broadcast %9 : vector<1x256xf32> to vector<8x256xf32>
    %11 = arith.addf %8, %10 : vector<8x256xf32>
    %cst_10 = arith.constant 0.000000e+00 : f32
    %12 = vector.broadcast %cst_10 : f32 to vector<8x256xf32>
    %13 = arith.maximumf %11, %12 : vector<8x256xf32>
    %14 = arith.truncf %13 : vector<8x256xf32> to vector<8x256xbf16>
    %c0_11 = arith.constant 0 : index
    %c0_12 = arith.constant 0 : index
    %15 = vector.load %arg6[%c0_11, %c0_12] : memref<256x256xbf16, #tpu.memory_space<vmem>>, vector<256x256xbf16>
    %cst_13 = arith.constant dense<0.000000e+00> : vector<8x256xf32>
    %16 = tpu.matmul %14, %15, %cst_13 {dimension_numbers = #tpu.dot_dimension_numbers<[1], [0], [0], [1], [0, 0, 1, 1], [], []>} : vector<8x256xbf16>, vector<256x256xbf16>, vector<8x256xf32> -> vector<8x256xf32>
    %c0_14 = arith.constant 0 : index
    %c0_15 = arith.constant 0 : index
    %17 = vector.load %arg7[%c0_14, %c0_15] : memref<1x256xf32, #tpu.memory_space<vmem>>, vector<1x256xf32>
    %18 = vector.broadcast %17 : vector<1x256xf32> to vector<8x256xf32>
    %19 = arith.addf %16, %18 : vector<8x256xf32>
    %cst_16 = arith.constant 0.000000e+00 : f32
    %20 = vector.broadcast %cst_16 : f32 to vector<8x256xf32>
    %21 = arith.maximumf %19, %20 : vector<8x256xf32>
    %22 = arith.truncf %21 : vector<8x256xf32> to vector<8x256xbf16>
    %c0_17 = arith.constant 0 : index
    %c0_18 = arith.constant 0 : index
    %23 = vector.load %arg8[%c0_17, %c0_18] : memref<256x8xbf16, #tpu.memory_space<vmem>>, vector<256x8xbf16>
    %cst_19 = arith.constant dense<0.000000e+00> : vector<8x8xf32>
    %24 = tpu.matmul %22, %23, %cst_19 {dimension_numbers = #tpu.dot_dimension_numbers<[1], [0], [0], [1], [0, 0, 1, 1], [], []>} : vector<8x256xbf16>, vector<256x8xbf16>, vector<8x8xf32> -> vector<8x8xf32>
    %c0_20 = arith.constant 0 : index
    %25 = memref.load %arg9[%c0_20] : memref<1xf32, #tpu.memory_space<smem>>
    %26 = vector.broadcast %25 : f32 to vector<8x8xf32>
    %27 = arith.addf %24, %26 : vector<8x8xf32>
    %c0_21 = arith.constant 0 : index
    %c0_22 = arith.constant 0 : index
    %28 = vector.load %arg10[%c0_21, %c0_22] : memref<8x8xf32, #tpu.memory_space<vmem>>, vector<8x8xf32>
    tpu.vector_store %arg10[%c0_21, %c0_22], %27 {strides = array<i32>} : memref<8x8xf32, #tpu.memory_space<vmem>>, vector<8x8xf32>,
    return
  }
  func.func @transform_0(%arg0: i32) -> (i32, i32) {
    %c0_i32 = arith.constant 0 : i32
    %c0_i32_0 = arith.constant 0 : i32
    return %arg0, %c0_i32 : i32, i32
  }
  func.func @transform_1(%arg0: i32) -> (i32, i32) {
    %c0_i32 = arith.constant 0 : i32
    %c0_i32_0 = arith.constant 0 : i32
    return %arg0, %c0_i32 : i32, i32
  }
  func.func @transform_2(%arg0: i32) -> (i32, i32) {
    %c0_i32 = arith.constant 0 : i32
    %c0_i32_0 = arith.constant 0 : i32
    %c0_i32_1 = arith.constant 0 : i32
    return %c0_i32, %c0_i32_0 : i32, i32
  }
  func.func @transform_3(%arg0: i32) -> (i32, i32) {
    %c0_i32 = arith.constant 0 : i32
    %c0_i32_0 = arith.constant 0 : i32
    %c0_i32_1 = arith.constant 0 : i32
    return %c0_i32, %c0_i32_0 : i32, i32
  }
  func.func @transform_4(%arg0: i32) -> (i32, i32) {
    %c0_i32 = arith.constant 0 : i32
    %c0_i32_0 = arith.constant 0 : i32
    %c0_i32_1 = arith.constant 0 : i32
    return %c0_i32, %c0_i32_0 : i32, i32
  }
  func.func @transform_5(%arg0: i32) -> (i32, i32) {
    %c0_i32 = arith.constant 0 : i32
    %c0_i32_0 = arith.constant 0 : i32
    %c0_i32_1 = arith.constant 0 : i32
    return %c0_i32, %c0_i32_0 : i32, i32
  }
  func.func @transform_6(%arg0: i32) -> (i32, i32) {
    %c0_i32 = arith.constant 0 : i32
    %c0_i32_0 = arith.constant 0 : i32
    %c0_i32_1 = arith.constant 0 : i32
    return %c0_i32, %c0_i32_0 : i32, i32
  }
  func.func @transform_7(%arg0: i32) -> (i32, i32) {
    %c0_i32 = arith.constant 0 : i32
    %c0_i32_0 = arith.constant 0 : i32
    %c0_i32_1 = arith.constant 0 : i32
    return %c0_i32, %c0_i32_0 : i32, i32
  }
  func.func @transform_8(%arg0: i32) -> i32 {
    %c0_i32 = arith.constant 0 : i32
    %c0_i32_0 = arith.constant 0 : i32
    return %c0_i32 : i32
  }
  func.func @transform_9(%arg0: i32) -> (i32, i32) {
    %c0_i32 = arith.constant 0 : i32
    %c0_i32_0 = arith.constant 0 : i32
    return %arg0, %c0_i32 : i32, i32
  }
}

</mosaic_0001>

<bundles_post_ra>
// kernel: tpu_custom_call.1
= control target key start
LH: loop header
LB: loop body
LE: loop exit
PB: predicated region body
PF: predicated region fallthrough
CT: control target
= control target key end

     0   :  { %15 = vsyncpa [#allocation4], 0  ;;  %s1379_s0 = inlined_call_operand.vmem [shape: f32[8,64], index: 0, kind: input, shape index: {}]   ;;  %s1380_s1 = inlined_call_operand.hbm [shape: f32[8,64], index: 1, kind: input, shape index: {}]   ;;  %s1381_s2 = inlined_call_operand.vmem [shape: bf16[64,256], index: 2, kind: input, shape index: {}]   ;;  %s1382_s3 = inlined_call_operand.vmem [shape: bf16[64,256], index: 3, kind: input, shape index: {}]   ;;  %s1383_s4 = inlined_call_operand.hbm [shape: f32[1,256], index: 4, kind: input, shape index: {}]   ;;  %s1384_s5 = inlined_call_operand.hbm [shape: bf16[256,256], index: 5, kind: input, shape index: {}]   ;;  %s1385_s6 = inlined_call_operand.hbm [shape: f32[1,256], index: 6, kind: input, shape index: {}]   ;;  %s1386_s7 = inlined_call_operand.vmem [shape: bf16[256,8], index: 7, kind: input, shape index: {}]   ;;  %s1387_s8 = inlined_call_operand.<no memory space> [shape: f32[1], index: 8, kind: input, shape index: {}]   ;;  %s1388_s9 = inlined_call_operand.hbm [shape: f32[8,8], index: 9, kind: output, shape index: {}]  }
   0x1   :  { %16 = vsyncpa [#allocation7], 0 }
   0x2   :  { %17 = vsyncpa [#allocation10], 0  ;;  %s41_s11 = sshll.u32 %s1383_s4, 4  ;;  %s42_s11 = int_to_ptr.hbm [resolvable:$true] %s41_s11 }
   0x3   :  { %18 = vsyncpa [#allocation5], 0  ;;  %s1153_s12 = smov [#allocation6]   ;;  %s26_s16 = sshll.u32 %s1380_s1, 4  ;;  %s27_s16 = int_to_ptr.hbm [resolvable:$true] %s26_s16 }
   0x4   :  { %s43_s13 = sshll.u32 %s1153_s12, 4  ;;  %s1154_s17 = smov [#allocation3]   ;;  %s44_s13 = int_to_ptr.vmem [resolvable:$true] %s43_s13 }
   0x5   :  { %46 = dma.hbm_to_vmem [thread:$0]  %s42_s11, 32, %s44_s13, [#allocation7]  }
   0x6   :  { %s28_s18 = sshll.u32 %s1154_s17, 4  ;;  %s51_s21 = sshll.u32 %s1384_s5, 4  ;;  %s29_s18 = int_to_ptr.vmem [resolvable:$true] %s28_s18  ;;  %s52_s21 = int_to_ptr.hbm [resolvable:$true] %s51_s21 }
   0x7   :  { %31 = dma.hbm_to_vmem [thread:$0]  %s27_s16, 128, %s29_s18, [#allocation4]  }
   0x8   :  { %s1155_s4 = smov [#allocation8]   ;;  %s65_s25 = sshll.u32 %s1385_s6, 4  ;;  %s66_s25 = int_to_ptr.hbm [resolvable:$true] %s65_s25 }
   0x9   :  { %s53_s22 = sshll.u32 %s1155_s4, 4  ;;  %s1156_s26 = smov 128   ;;  %s54_s22 = int_to_ptr.vmem [resolvable:$true] %s53_s22 }
   0xa   :  { %s1157_s1 = smov 8   ;;  %s1158_s27 = smov [#allocation9]  }
   0xb   :  { %59 = dma.hbm_to_vmem [thread:$0]  %s52_s21, 4096, %s54_s22, [#allocation7], %s1156_s26, %s1156_s26, %s1157_s1  }
   0xc   :  { %s67_s28 = sshll.u32 %s1158_s27, 4  ;;  %s68_s28 = int_to_ptr.vmem [resolvable:$true] %s67_s28 }
   0xd   :  { %70 = dma.hbm_to_vmem [thread:$0]  %s66_s25, 32, %s68_s28, [#allocation10]  }
   0xe   :  { %1145 = dma.done.wait [#allocation4], 128  }
   0xf   :  { %1146 = vsyncadd [#allocation4], 4294967168 }
  0x10   :  { %1147 = dma.done.wait [#allocation7], 4128  }
  0x11   :  { %1148 = vsyncadd [#allocation7], 4294963168 }
  0x12   :  { %1149 = dma.done.wait [#allocation10], 32  }
  0x13   :  { %1150 = vsyncadd [#allocation10], 4294967264  ;;  %v720_v0 = vld [vmem:[%s1382_s3 + $0x30] sm:$0xf]  ;;  %v969_v1 = vld [vmem:[%s1382_s3 + $0x34] sm:$0xf0] }
  0x14   :  { %v968_v2 = vld [vmem:[%s1382_s3 + $0x34] sm:$0xf]  ;;  %v721_v3 = vor.u32 %v969_v1, %v720_v0  ;;  %v722_v4 = vld [vmem:[%s1382_s3 + $0x38] sm:$0xf0]  ;;  %v712_v5 = vld [vmem:[%s1382_s3 + $0x20] sm:$0xf] }
  0x15   :  { %v967_v6 = vld [vmem:[%s1382_s3 + $0x24] sm:$0xf0]  ;;  %v725_v7 = vor.u32 %v968_v2, %v722_v4  ;;  %v966_v8 = vld [vmem:[%s1382_s3 + $0x24] sm:$0xf]  ;;  %v714_v9 = vld [vmem:[%s1382_s3 + $0x28] sm:$0xf0] }
  0x16   :  { %160 = vmatpush.bf16.msra.mxu2 %v721_v3  ;;  %v713_v10 = vor.u32 %v967_v6, %v712_v5  ;;  %v717_v11 = vor.u32 %v966_v8, %v714_v9  ;;  %v704_v12 = vld [vmem:[%s1382_s3 + $0x10] sm:$0xf]  ;;  %v965_v13 = vld [vmem:[%s1382_s3 + $0x14] sm:$0xf0]  ;;  %v964_v14 = vld [vmem:[%s1382_s3 + $0x14] sm:$0xf] }
  0x17   :  { %173 = vmatpush.bf16.msra.mxu3 %v725_v7  ;;  %v706_v15 = vld [vmem:[%s1382_s3 + $0x18] sm:$0xf0]  ;;  %v705_v16 = vor.u32 %v965_v13, %v704_v12  ;;  %v696_v18 = vld [vmem:[%s1382_s3] sm:$0xf]  ;;  %v963_v19 = vld [vmem:[%s1382_s3 + $0x4] sm:$0xf0] }
  0x18   :  { %v709_v17 = vor.u32 %v964_v14, %v706_v15  ;;  %v962_v20 = vld [vmem:[%s1382_s3 + $0x4] sm:$0xf]  ;;  %v698_v21 = vld [vmem:[%s1382_s3 + $0x8] sm:$0xf0]  ;;  %v754_v22 = vld [vmem:[%s1381_s2 + $0x30] sm:$0xf]  ;;  %v697_v26 = vor.u32 %v963_v19, %v696_v18 }
  0x19   :  { %v961_v23 = vld [vmem:[%s1381_s2 + $0x34] sm:$0xf0]  ;;  %v960_v24 = vld [vmem:[%s1381_s2 + $0x34] sm:$0xf]  ;;  %v756_v25 = vld [vmem:[%s1381_s2 + $0x38] sm:$0xf0]  ;;  %v701_v30 = vor.u32 %v962_v20, %v698_v21 }
  0x1a   :  { %161 = vmatpush.bf16.msra.mxu2 %v713_v10  ;;  %v94_v27 = vld [vmem:[#allocation3] sm:$0xff]  ;;  %v820_v28 = vld [vmem:[#allocation8 + $0x70] sm:$0xf]  ;;  %v755_v31 = vor.u32 %v961_v23, %v754_v22  ;;  %v759_v36 = vor.u32 %v960_v24, %v756_v25  ;;  %v959_v37 = vld [vmem:[%s1381_s2 + $0x24] sm:$0xf0]  ;;  %vm152_vm0 = vcmask 523264  }
  0x1b   :  { %174 = vmatpush.bf16.msra.mxu3 %v717_v11  ;;  %v985_v29 = vld [vmem:[#allocation8 + $0x74] sm:$0xf0]  ;;  %v884_v34 = vld [vmem:[#allocation8 + $0xf0] sm:$0xf]  ;;  %v748_v39 = vld [vmem:[%s1381_s2 + $0x28] sm:$0xf0]  ;;  %v95_v41 = vpack.c.bf16 %v94_v27, %v94_v27 }
  0x1c   :  { %v746_v32 = vld [vmem:[%s1381_s2 + $0x20] sm:$0xf]  ;;  %v821_v33 = vor.u32 %v985_v29, %v820_v28  ;;  %v958_v38 = vld [vmem:[%s1381_s2 + $0x24] sm:$0xf]  ;;  %v812_v42 = vld [vmem:[#allocation8 + $0x60] sm:$0xf] }
  0x1d   :  { %v1001_v35 = vld [vmem:[#allocation8 + $0xf4] sm:$0xf0]  ;;  %v983_v43 = vld [vmem:[#allocation8 + $0x64] sm:$0xf0]  ;;  %v876_v44 = vld [vmem:[#allocation8 + $0xe0] sm:$0xf]  ;;  %v747_v47 = vor.u32 %v959_v37, %v746_v32  ;;  %v751_v49 = vor.u32 %v958_v38, %v748_v39 }
  0x1e   :  { %162 = vmatpush.bf16.msra.mxu2 %v705_v16  ;;  %v885_v40 = vor.u32 %v1001_v35, %v884_v34  ;;  %461 = vmatpush.bf16.msra.mxu0 %v821_v33  ;;  %v813_v45 = vor.u32 %v983_v43, %v812_v42  ;;  %v999_v46 = vld [vmem:[#allocation8 + $0xe4] sm:$0xf0]  ;;  %v957_v51 = vld [vmem:[%s1381_s2 + $0x14] sm:$0xf0]  ;;  %v740_v53 = vld [vmem:[%s1381_s2 + $0x18] sm:$0xf0] }
  0x1f   :  { %175 = vmatpush.bf16.msra.mxu3 %v709_v17  ;;  %v877_v48 = vor.u32 %v999_v46, %v876_v44  ;;  %v738_v50 = vld [vmem:[%s1381_s2 + $0x10] sm:$0xf]  ;;  %v956_v52 = vld [vmem:[%s1381_s2 + $0x14] sm:$0xf]  ;;  %v730_v56 = vld [vmem:[%s1381_s2] sm:$0xf] }
  0x20   :  { %474 = vmatpush.bf16.msra.mxu1 %v885_v40  ;;  %v739_v54 = vor.u32 %v957_v51, %v738_v50  ;;  %v743_v55 = vor.u32 %v956_v52, %v740_v53  ;;  %v955_v57 = vld [vmem:[%s1381_s2 + $0x4] sm:$0xf0]  ;;  %v954_v58 = vld [vmem:[%s1381_s2 + $0x4] sm:$0xf]  ;;  %v732_v59 = vld [vmem:[%s1381_s2 + $0x8] sm:$0xf0] }
  0x21   :  { %v984_v60 = vld [vmem:[#allocation8 + $0x74] sm:$0xf]  ;;  %v822_v61 = vld [vmem:[#allocation8 + $0x78] sm:$0xf0]  ;;  %v731_v0 = vor.u32 %v955_v57, %v730_v56  ;;  %v735_v1 = vor.u32 %v954_v58, %v732_v59  ;;  %v982_v4 = vld [vmem:[#allocation8 + $0x64] sm:$0xf] }
  0x22   :  { %163 = vmatpush.bf16.msra.mxu2 %v697_v26  ;;  %462 = vmatpush.bf16.msra.mxu0 %v813_v45  ;;  %v1000_v62 = vld [vmem:[#allocation8 + $0xf4] sm:$0xf]  ;;  %v886_v63 = vld [vmem:[#allocation8 + $0xf8] sm:$0xf0]  ;;  %v825_v2 = vor.u32 %v984_v60, %v822_v61  ;;  %v814_v5 = vld [vmem:[#allocation8 + $0x68] sm:$0xf0] }
  0x23   :  { %176 = vmatpush.bf16.msra.mxu3 %v701_v30  ;;  %v889_v3 = vor.u32 %v1000_v62, %v886_v63  ;;  %v92_v6 = vld [vmem:[%s1379_s0] sm:$0xff]  ;;  %v998_v7 = vld [vmem:[#allocation8 + $0xe4] sm:$0xf]  ;;  %v878_v8 = vld [vmem:[#allocation8 + $0xe8] sm:$0xf0]  ;;  %v817_v9 = vor.u32 %v982_v4, %v814_v5  ;;  %s1159_s22 = smov [#allocation11]  }
  0x24   :  { %475 = vmatpush.bf16.msra.mxu1 %v877_v48  ;;  %v93_v10 = vpack.c.bf16 %v92_v6, %v92_v6  ;;  %v881_v11 = vor.u32 %v998_v7, %v878_v8  ;;  %v804_v12 = vld [vmem:[#allocation8 + $0x50] sm:$0xf]  ;;  %v981_v13 = vld [vmem:[#allocation8 + $0x54] sm:$0xf0]  ;;  %v980_v17 = vld [vmem:[#allocation8 + $0x54] sm:$0xf] }
  0x25   :  { %726 = vmatmul.msk.bf16.vlgmr.msra.gmra.mxu2 %vm152_vm0, %v95_v41  ;;  %v868_v14 = vld [vmem:[#allocation8 + $0xd0] sm:$0xf]  ;;  %v805_v15 = vor.u32 %v981_v13, %v804_v12  ;;  %v997_v16 = vld [vmem:[#allocation8 + $0xd4] sm:$0xf0]  ;;  %v806_v18 = vld [vmem:[#allocation8 + $0x58] sm:$0xf0] }
  0x26   :  { %229 = vmatpush.bf16.msrb.mxu2 %v755_v31  ;;  %727 = vmatmul.msk.bf16.vlgmr.msra.gmra.mxu3 %vm152_vm0, %v95_v41  ;;  %v869_v19 = vor.u32 %v997_v16, %v868_v14  ;;  %v809_v20 = vor.u32 %v980_v17, %v806_v18  ;;  %v996_v21 = vld [vmem:[#allocation8 + $0xd4] sm:$0xf]  ;;  %v870_v22 = vld [vmem:[#allocation8 + $0xd8] sm:$0xf0]  ;;  %v796_v23 = vld [vmem:[#allocation8 + $0x40] sm:$0xf] }
  0x27   :  { %242 = vmatpush.bf16.msrb.mxu3 %v759_v36  ;;  %463 = vmatpush.bf16.msra.mxu0 %v805_v15  ;;  %v873_v24 = vor.u32 %v996_v21, %v870_v22  ;;  %v979_v25 = vld [vmem:[#allocation8 + $0x44] sm:$0xf0]  ;;  %v860_v26 = vld [vmem:[#allocation8 + $0xc0] sm:$0xf]  ;;  %v978_v30 = vld [vmem:[#allocation8 + $0x44] sm:$0xf] }
  0x28   :  { %v995_v27 = vld [vmem:[#allocation8 + $0xc4] sm:$0xf0]  ;;  %476 = vmatpush.bf16.msra.mxu1 %v869_v19  ;;  %v797_v28 = vor.u32 %v979_v25, %v796_v23  ;;  %v798_v31 = vld [vmem:[#allocation8 + $0x48] sm:$0xf0]  ;;  %v994_v32 = vld [vmem:[#allocation8 + $0xc4] sm:$0xf] }
  0x29   :  { %v861_v29 = vor.u32 %v995_v27, %v860_v26  ;;  %v801_v33 = vor.u32 %v978_v30, %v798_v31  ;;  %v862_v34 = vld [vmem:[#allocation8 + $0xc8] sm:$0xf0]  ;;  %v788_v36 = vld [vmem:[#allocation8 + $0x30] sm:$0xf]  ;;  %v977_v37 = vld [vmem:[#allocation8 + $0x34] sm:$0xf0] }
  0x2a   :  { %230 = vmatpush.bf16.msrb.mxu2 %v747_v47  ;;  %v865_v35 = vor.u32 %v994_v32, %v862_v34  ;;  %v852_v38 = vld [vmem:[#allocation8 + $0xb0] sm:$0xf]  ;;  %v789_v39 = vor.u32 %v977_v37, %v788_v36  ;;  %v993_v40 = vld [vmem:[#allocation8 + $0xb4] sm:$0xf0]  ;;  %v976_v41 = vld [vmem:[#allocation8 + $0x34] sm:$0xf] }
  0x2b   :  { %243 = vmatpush.bf16.msrb.mxu3 %v751_v49  ;;  %464 = vmatpush.bf16.msra.mxu0 %v797_v28  ;;  %v790_v42 = vld [vmem:[#allocation8 + $0x38] sm:$0xf0]  ;;  %v853_v43 = vor.u32 %v993_v40, %v852_v38  ;;  %v992_v45 = vld [vmem:[#allocation8 + $0xb4] sm:$0xf]  ;;  %v780_v47 = vld [vmem:[#allocation8 + $0x20] sm:$0xf] }
  0x2c   :  { %477 = vmatpush.bf16.msra.mxu1 %v861_v29  ;;  %v793_v44 = vor.u32 %v976_v41, %v790_v42  ;;  %v854_v46 = vld [vmem:[#allocation8 + $0xb8] sm:$0xf0]  ;;  %v975_v49 = vld [vmem:[#allocation8 + $0x24] sm:$0xf0]  ;;  %v844_v50 = vld [vmem:[#allocation8 + $0xa0] sm:$0xf] }
  0x2d   :  { %v857_v48 = vor.u32 %v992_v45, %v854_v46  ;;  %v991_v51 = vld [vmem:[#allocation8 + $0xa4] sm:$0xf0]  ;;  %v781_v52 = vor.u32 %v975_v49, %v780_v47  ;;  %v990_v56 = vld [vmem:[#allocation8 + $0xa4] sm:$0xf]  ;;  %v846_v58 = vld [vmem:[#allocation8 + $0xa8] sm:$0xf0] }
  0x2e   :  { %231 = vmatpush.bf16.msrb.mxu2 %v739_v54  ;;  %v845_v53 = vor.u32 %v991_v51, %v844_v50  ;;  %v974_v54 = vld [vmem:[#allocation8 + $0x24] sm:$0xf]  ;;  %v849_v59 = vor.u32 %v990_v56, %v846_v58  ;;  %v772_v60 = vld [vmem:[#allocation8 + $0x10] sm:$0xf]  ;;  %v973_v61 = vld [vmem:[#allocation8 + $0x14] sm:$0xf0] }
  0x2f   :  { %244 = vmatpush.bf16.msrb.mxu3 %v743_v55  ;;  %465 = vmatpush.bf16.msra.mxu0 %v789_v39  ;;  %v782_v55 = vld [vmem:[#allocation8 + $0x28] sm:$0xf0]  ;;  %v836_v62 = vld [vmem:[#allocation8 + $0x90] sm:$0xf]  ;;  %v773_v63 = vor.u32 %v973_v61, %v772_v60  ;;  %v988_v5 = vld [vmem:[#allocation8 + $0x94] sm:$0xf] }
  0x30   :  { %478 = vmatpush.bf16.msra.mxu1 %v853_v43  ;;  %v785_v57 = vor.u32 %v974_v54, %v782_v55  ;;  %v838_v6 = vld [vmem:[#allocation8 + $0x98] sm:$0xf0]  ;;  %v764_v7 = vld [vmem:[#allocation8] sm:$0xf]  ;;  %v970_v14 = vld [vmem:[#allocation8 + $0x4] sm:$0xf] }
  0x31   :  { %v841_v8 = vor.u32 %v988_v5, %v838_v6  ;;  %v766_v15 = vld [vmem:[#allocation8 + $0x8] sm:$0xf0]  ;;  %v986_v16 = vld [vmem:[#allocation8 + $0x84] sm:$0xf]  ;;  %v1006_v28 = vld [vmem:[%s1386_s7 + $0x20] sm:$0xff]  ;;  %s680_s23 = sshll.u32 %s1159_s22, 4  ;;  %s681_s23 = int_to_ptr.vmem [resolvable:$true] %s680_s23 }
  0x32   :  { %232 = vmatpush.bf16.msrb.mxu2 %v731_v0  ;;  %v989_v0 = vld [vmem:[#allocation8 + $0x94] sm:$0xf0]  ;;  %v769_v17 = vor.u32 %v970_v14, %v766_v15  ;;  %v830_v18 = vld [vmem:[#allocation8 + $0x88] sm:$0xf0]  ;;  %v1007_v25 = vld [vmem:[%s1386_s7 + $0x28] sm:$0xff]  ;;  %s682_s26 = sshll.u32 %s1388_s9, 4  ;;  %s683_s26 = int_to_ptr.hbm [resolvable:$true] %s682_s26 }
  0x33   :  { %245 = vmatpush.bf16.msrb.mxu3 %v735_v1  ;;  %466 = vmatpush.bf16.msra.mxu0 %v781_v52  ;;  %v972_v1 = vld [vmem:[#allocation8 + $0x14] sm:$0xf]  ;;  %v833_v19 = vor.u32 %v986_v16, %v830_v18  ;;  %v1008_v22 = vld [vmem:[%s1386_s7 + $0x30] sm:$0xff]  ;;  %v1015_v26 = vld [vmem:[%s1386_s7 + $0x68] sm:$0xff]  ;;  %vm673_vm1 = vcmask 64512  }
  0x34   :  { %479 = vmatpush.bf16.msra.mxu1 %v845_v53  ;;  %v1017_v21 = vld [vmem:[%s1386_s7 + $0x78] sm:$0xff]  ;;  %v1016_v23 = vld [vmem:[%s1386_s7 + $0x70] sm:$0xff]  ;;  %v1014_v29 = vld [vmem:[%s1386_s7 + $0x60] sm:$0xff] }
  0x35   :  { %760 = vmatmul.msk.bf16.vlgmr.msrb.gmra.mxu2 %vm152_vm0, %v93_v10  ;;  %v1005_v31 = vld [vmem:[%s1386_s7 + $0x18] sm:$0xff]  ;;  %v1004_v34 = vld [vmem:[%s1386_s7 + $0x10] sm:$0xff]  ;;  %v1003_v50 = vld [vmem:[%s1386_s7 + $0x8] sm:$0xff] }
  0x36   :  { %487 = vmatpush.bf16.msra.mxu2 %v825_v2  ;;  %761 = vmatmul.msk.bf16.vlgmr.msrb.gmra.mxu3 %vm152_vm0, %v93_v10  ;;  %v774_v2 = vld [vmem:[#allocation8 + $0x18] sm:$0xf0]  ;;  %v828_v10 = vld [vmem:[#allocation8 + $0x80] sm:$0xf]  ;;  %v1013_v49 = vld [vmem:[%s1386_s7 + $0x58] sm:$0xff] }
  0x37   :  { %500 = vmatpush.bf16.msra.mxu3 %v889_v3  ;;  %v837_v3 = vor.u32 %v989_v0, %v836_v62  ;;  %v777_v4 = vor.u32 %v972_v1, %v774_v2  ;;  %467 = vmatpush.bf16.msra.mxu0 %v773_v63  ;;  %v1012_v51 = vld [vmem:[%s1386_s7 + $0x50] sm:$0xff]  ;;  %v1002_v52 = vld [vmem:[%s1386_s7] sm:$0xff]  ;;  %v1011_v53 = vld [vmem:[%s1386_s7 + $0x48] sm:$0xff] }
  0x38   :  { %v1010_v54 = vld [vmem:[%s1386_s7 + $0x40] sm:$0xff]  ;;  %v295_v55 = vld [vmem:[#allocation9] sm:$0x3] }
  0x39   :  { %480 = vmatpush.bf16.msra.mxu1 %v837_v3  ;;  %v297_v56 = vperm.slane %v295_v55, 0  ;;  %v298_v61 = vperm.slane %v295_v55, 1 }
  0x3a   :  { %488 = vmatpush.bf16.msra.mxu2 %v817_v9  ;;  %v971_v9 = vld [vmem:[#allocation8 + $0x4] sm:$0xf0] }
  0x3b   :  { %501 = vmatpush.bf16.msra.mxu3 %v881_v11  ;;  %v987_v11 = vld [vmem:[#allocation8 + $0x84] sm:$0xf0]  ;;  %v765_v12 = vor.u32 %v971_v9, %v764_v7 }
  0x3c   :  { %v829_v13 = vor.u32 %v987_v11, %v828_v10  ;;  %v550_v11 = vstv %s1387_s8 }
  0x3d   :  { %468 = vmatpush.bf16.msra.mxu0 %v765_v12 }
  0x3e   :  { %489 = vmatpush.bf16.msra.mxu2 %v809_v20  ;;  %481 = vmatpush.bf16.msra.mxu1 %v829_v13  ;;  %v1009_v20 = vld [vmem:[%s1386_s7 + $0x38] sm:$0xff] }
  0x3f   :  { %502 = vmatpush.bf16.msra.mxu3 %v873_v24 }
  0x41   :  { %647 = vmatpush.bf16.msrb.mxu0 %v1009_v20 }
  0x42   :  { %490 = vmatpush.bf16.msra.mxu2 %v801_v33  ;;  %660 = vmatpush.bf16.msrb.mxu1 %v1017_v21  ;;  %v251_v33 = vld [vmem:[#allocation6] sm:$0x3] }
  0x43   :  { %503 = vmatpush.bf16.msra.mxu3 %v865_v35  ;;  %v253_v35 = vperm.slane %v251_v33, 0  ;;  %v254_v37 = vperm.slane %v251_v33, 1 }
  0x45   :  { %648 = vmatpush.bf16.msrb.mxu0 %v1008_v22 }
  0x46   :  { %491 = vmatpush.bf16.msra.mxu2 %v793_v44  ;;  %661 = vmatpush.bf16.msrb.mxu1 %v1016_v23 }
  0x47   :  { %504 = vmatpush.bf16.msra.mxu3 %v857_v48 }
  0x49   :  { %649 = vmatpush.bf16.msrb.mxu0 %v1007_v25 }
  0x4a   :  { %492 = vmatpush.bf16.msra.mxu2 %v785_v57  ;;  %662 = vmatpush.bf16.msrb.mxu1 %v1015_v26 }
  0x4b   :  { %505 = vmatpush.bf16.msra.mxu3 %v849_v59 }
  0x4d   :  { %650 = vmatpush.bf16.msrb.mxu0 %v1006_v28 }
  0x4e   :  { %493 = vmatpush.bf16.msra.mxu2 %v777_v4  ;;  %663 = vmatpush.bf16.msrb.mxu1 %v1014_v29 }
  0x4f   :  { %506 = vmatpush.bf16.msra.mxu3 %v841_v8 }
  0x51   :  { %651 = vmatpush.bf16.msrb.mxu0 %v1005_v31 }
  0x52   :  { %494 = vmatpush.bf16.msra.mxu2 %v769_v17  ;;  %664 = vmatpush.bf16.msrb.mxu1 %v1013_v49 }
  0x53   :  { %507 = vmatpush.bf16.msra.mxu3 %v833_v19 }
  0x55   :  { %652 = vmatpush.bf16.msrb.mxu0 %v1004_v34 }
  0x56   :  { %665 = vmatpush.bf16.msrb.mxu1 %v1012_v51 }
  0x59   :  { %653 = vmatpush.bf16.msrb.mxu0 %v1003_v50 }
  0x5a   :  { %666 = vmatpush.bf16.msrb.mxu1 %v1011_v53 }
  0x5d   :  { %654 = vmatpush.bf16.msrb.mxu0 %v1002_v52 }
  0x5e   :  { %667 = vmatpush.bf16.msrb.mxu1 %v1010_v54 }
  0xa8   :  { %v165_v24 = vpop.f32.mrf.mxu2 }
  0xa9   :  { %v178_v27 = vpop.f32.mrf.mxu3 }
  0xb0   :  { %v167_v30 = vpop.f32.mrf.mxu2 }
  0xb1   :  { %v180_v32 = vpop.f32.mrf.mxu3 }
  0xb8   :  { %v234_v36 = vpop.f32.mrf.mxu2 }
  0xb9   :  { %v235_v38 = vadd.f32 %v234_v36, %v165_v24  ;;  %v247_v39 = vpop.f32.mrf.mxu3 }
  0xba   :  { %v248_v40 = vadd.f32 %v247_v39, %v178_v27 }
  0xbb   :  { %v257_v41 = vadd.f32 %v253_v35, %v235_v38 }
  0xbc   :  { %v258_v42 = vadd.f32 %v254_v37, %v248_v40 }
  0xbd   :  { %v259_v43 = vmax.f32 %v257_v41, 0.0 }
  0xbe   :  { %v260_v44 = vmax.f32 %v258_v42, 0.0 }
  0xbf   :  { %v261_v45 = vpack.c.bf16 %v259_v43, %v259_v43 }
  0xc0   :  { %v236_v46 = vpop.f32.mrf.mxu2  ;;  %v262_v47 = vpack.c.bf16 %v260_v44, %v260_v44 }
  0xc1   :  { %v249_v48 = vpop.f32.mrf.mxu3  ;;  %469 = vmatmul.bf16.vlgmr.msra.gmra.mxu0 %v261_v45  ;;  %495 = vmatmul.bf16.vlgmr.msra.gmra.mxu2 %v261_v45 }
  0xc2   :  { %482 = vmatmul.bf16.vlgmr.msra.gmra.mxu1 %v262_v47  ;;  %508 = vmatmul.bf16.vlgmr.msra.gmra.mxu3 %v262_v47 }
 0x13e   :  { %v470_v57 = vpop.f32.mrf.mxu0 }
 0x13f   :  { %v471_v58 = vadd.f32 %v470_v57, %v297_v56  ;;  %v483_v59 = vpop.f32.mrf.mxu1 }
 0x141   :  { %v484_v60 = vadd.f32 %v483_v59, %v471_v58 }
 0x143   :  { %v513_v62 = vmax.f32 %v484_v60, 0.0 }
 0x144   :  { %v496_v63 = vpop.f32.mrf.mxu2 }
 0x145   :  { %v515_v0 = vpack.c.bf16 %v513_v62, %v513_v62  ;;  %v497_v1 = vadd.f32 %v496_v63, %v298_v61  ;;  %v509_v2 = vpop.f32.mrf.mxu3 }
 0x146   :  { %v472_v3 = vpop.f32.mrf.mxu0 }
 0x147   :  { %v510_v4 = vadd.f32 %v509_v2, %v497_v1  ;;  %v485_v5 = vpop.f32.mrf.mxu1  ;;  %655 = vmatmul.bf16.vlgmr.msrb.gmra.mxu0 %v515_v0 }
 0x149   :  { %v514_v6 = vmax.f32 %v510_v4, 0.0 }
 0x14b   :  { %v516_v7 = vpack.c.bf16 %v514_v6, %v514_v6 }
 0x14c   :  { %v498_v8 = vpop.f32.mrf.mxu2 }
 0x14d   :  { %v511_v9 = vpop.f32.mrf.mxu3  ;;  %668 = vmatmul.bf16.vlgmr.msrb.gmra.mxu1 %v516_v7 }
 0x1c4   :  { %v656_v10 = vpop.f32.mrf.mxu0 }
 0x1c5   :  { %v657_v12 = vadd.f32 %v656_v10, %v550_v11 }
 0x1ca   :  { %v669_v13 = vpop.f32.mrf.mxu1 }
 0x1cb   :  { %v670_v14 = vadd.f32 %v669_v13, %v657_v12 }
 0x1cc   :  { %v658_v15 = vpop.f32.mrf.mxu0 }
 0x1cd   :  { %674 = vst.msk [vmem:[#allocation11] sm:$0xff] %vm673_vm1, %v670_v14 }
 0x1ce   :  { %685 = dma.vmem_to_hbm [thread:$0]  %s681_s23, 128, %s683_s26, [#allocation5]  }
 0x1d2   :  { %v671_v16 = vpop.f32.mrf.mxu1 }
 0x1d3   :  { %1151 = dma.done.wait [#allocation5], 128  }
 0x1d4   :  { %1152 = vsyncadd [#allocation5], 4294967168 }
 0x1d5   :  { %690 = vsyncpa [#allocation4], 1 }
 0x1d6   :  { %691 = vsyncpa [#allocation7], 1 }
 0x1d7   :  { %692 = vsyncpa [#allocation10], 1 }
 0x1d8   :  { %693 = vsyncpa [#allocation5], 1 }

</bundles_post_ra>
